<compile_context>
chip_gen: v7x
topology: tpu7x:2x2x1
jax: 0.10.0
libtpu: 0.0.40
codegen_flags: <defaults>
</compile_context>

<pallas_src>
import functools
import math

import jax
import jax.numpy as jnp
from jax import lax
from jax.experimental import pallas as pl
from jax.experimental.pallas import tpu as pltpu

DPAD = 128                 # lane-dense padded head dim: one full 128-lane group per q/k/v
MXU_DTYPE = jnp.bfloat16   # MXU operand dtype (f32 accumulate) - peak MXU path on v5e/v6e/v7x
_MASK_VALUE = -1e30        # causal fill; underflows to exactly 0 after max-subtract


def fuse_qkv_params(wq, bq, wk, bk, wv, bv):
    """Fuse + lane-pad the q/k/v Linear params.  Call ONCE at init time,
    never on the per-forward path (perf review item #1).

    Returns:
      w_qkv: (H, 3*DPAD) in MXU_DTYPE  -- each projection zero-padded to a full
             128-lane group so in-kernel slices are 128-aligned.
      b_qkv: (1, 3*DPAD) float32       -- bias stays f32 (added post f32-accumulate).
    """
    d = wq.shape[1]

    def pad_cols(a):
        return jnp.pad(a, ((0, 0), (0, DPAD - d)))

    w_qkv = jnp.concatenate([pad_cols(wq), pad_cols(wk), pad_cols(wv)], axis=1)
    b_qkv = jnp.concatenate([pad_cols(bq), pad_cols(bk), pad_cols(bv)], axis=1)
    return w_qkv.astype(MXU_DTYPE), b_qkv.astype(jnp.float32)


def _flash_attn_kernel(xq_ref, xkv_ref, w_ref, b_ref, o_ref,
                       q_scr, m_scr, l_scr, acc_scr,
                       *, tq, tk, head_dim):
    # xq_ref:  (1, tq, H)  x rows for this q tile
    # xkv_ref: (1, tk, H)  x rows for this kv tile
    # w_ref:   (H, 3*DPAD) fused bf16 weights   b_ref: (1, 3*DPAD) f32 bias
    # o_ref:   (1, tq, head_dim)
    qi = pl.program_id(1)
    ki = pl.program_id(2)
    nk = pl.num_programs(2)

    @pl.when(ki == 0)
    def _init():
        # Online-softmax state init + q projection, once per (batch, q-tile).
        m_scr[...] = jnp.full_like(m_scr, -jnp.inf)
        l_scr[...] = jnp.zeros_like(l_scr)
        acc_scr[...] = jnp.zeros_like(acc_scr)
        xq = xq_ref[0].astype(MXU_DTYPE)                               # (tq, H)
        q = jnp.dot(xq, w_ref[:, 0:DPAD], preferred_element_type=jnp.float32)
        q = (q + b_ref[:, 0:DPAD]) * jnp.float32(1.0 / math.sqrt(head_dim))
        q_scr[...] = q.astype(q_scr.dtype)                             # bf16 MXU operand

    # Causal skip: drop KV tiles entirely above the diagonal for this q tile.
    @pl.when(ki * tk < (qi + 1) * tq)
    def _tile():
        # k/v projection for this KV tile (bf16 operands, f32 accumulate).
        xkv = xkv_ref[0].astype(MXU_DTYPE)                             # (tk, H)
        kv = jnp.dot(xkv, w_ref[:, DPAD:3 * DPAD],
                     preferred_element_type=jnp.float32) + b_ref[:, DPAD:3 * DPAD]
        k = kv[:, 0:DPAD].astype(MXU_DTYPE)
        v = kv[:, DPAD:2 * DPAD].astype(MXU_DTYPE)

        # scores (tq, tk) = q @ k^T: contract last axes (no XLU transpose).
        # Zero-padded lanes of q/k contribute nothing, so scores are exact.
        s = lax.dot_general(q_scr[...], k,
                            dimension_numbers=(((1,), (1,)), ((), ())),
                            preferred_element_type=jnp.float32)

        # In-tile causal mask from iota (VPU); no HBM mask buffer.
        row = qi * tq + lax.broadcasted_iota(jnp.int32, (tq, tk), 0)
        col = ki * tk + lax.broadcasted_iota(jnp.int32, (tq, tk), 1)
        s = jnp.where(row >= col, s, jnp.float32(_MASK_VALUE))

        # Online-softmax update; elementwise math stays f32 (no bf16 VPU/EUP on v5e).
        m_prev = m_scr[...]
        m_new = jnp.maximum(m_prev, jnp.max(s, axis=-1, keepdims=True))
        alpha = jnp.exp(m_prev - m_new)
        p = jnp.exp(s - m_new)
        l_scr[...] = alpha * l_scr[...] + jnp.sum(p, axis=-1, keepdims=True)
        acc_scr[...] = alpha * acc_scr[...] + jnp.dot(
            p.astype(MXU_DTYPE), v, preferred_element_type=jnp.float32)
        m_scr[...] = m_new

    @pl.when(ki == nk - 1)
    def _finalize():
        # Exact divide so attention rows sum to 1; store only the true head_dim
        # columns -> no 16x lane-padded HBM writeback, no wrapper-side slice.
        out = acc_scr[...][:, :head_dim] / l_scr[...]
        o_ref[0] = out.astype(o_ref.dtype)


def single_dot_attention(x, w_qkv, b_qkv, *, head_dim):
    """x: (B, S, H); w_qkv: (H, 3*DPAD) MXU_DTYPE; b_qkv: (1, 3*DPAD) f32.
    Returns (B, S, head_dim).  The per-call path is only this pallas_call."""
    B, S, H = x.shape
    assert w_qkv.shape == (H, 3 * DPAD) and b_qkv.shape == (1, 3 * DPAD)

    # Tile sizes: 256-multiples keep the v6e/v7x 2x256^2 MXU full (128 on v5e);
    # clamped to S for tiny sequences.  S must be a multiple of the tile.
    tq = min(S, 256)
    tk = min(S, 256)
    assert S % tq == 0 and S % tk == 0 and (tq % 8 == 0 or tq == S)
    nq = pl.cdiv(S, tq)
    nk = pl.cdiv(S, tk)

    flops = (2 * B * S * H * 3 * DPAD      # fused qkv projection (padded width)
             + 2 * B * S * S * DPAD        # q @ k^T
             + 2 * B * S * S * DPAD)       # attn @ v
    bytes_accessed = (2 * x.size * x.dtype.itemsize        # x read via q- and kv-streams
                      + w_qkv.size * w_qkv.dtype.itemsize
                      + b_qkv.size * b_qkv.dtype.itemsize
                      + B * S * head_dim * x.dtype.itemsize)

    grid_spec = pltpu.PrefetchScalarGridSpec(
        num_scalar_prefetch=0,
        grid=(B, nq, nk),
        in_specs=[
            pl.BlockSpec((1, tq, H), lambda b, qi, ki: (b, qi, 0)),   # x for q tile
            pl.BlockSpec((1, tk, H), lambda b, qi, ki: (b, ki, 0)),   # x for kv tile
            pl.BlockSpec((H, 3 * DPAD), lambda b, qi, ki: (0, 0)),    # fused W (resident)
            pl.BlockSpec((1, 3 * DPAD), lambda b, qi, ki: (0, 0)),    # fused bias
        ],
        out_specs=pl.BlockSpec((1, tq, head_dim), lambda b, qi, ki: (b, qi, 0)),
        scratch_shapes=[
            pltpu.VMEM((tq, DPAD), MXU_DTYPE),    # q tile (resident across kv steps)
            pltpu.VMEM((tq, 1), jnp.float32),     # m: running max
            pltpu.VMEM((tq, 1), jnp.float32),     # l: running denominator
            pltpu.VMEM((tq, DPAD), jnp.float32),  # acc: unnormalized output
        ],
    )

    return pl.pallas_call(
        functools.partial(_flash_attn_kernel, tq=tq, tk=tk, head_dim=head_dim),
        out_shape=jax.ShapeDtypeStruct((B, S, head_dim), x.dtype),
        grid_spec=grid_spec,
        compiler_params=pltpu.CompilerParams(
            # batch & q-tile axes shard across TensorCores (v7x megacore);
            # kv axis is the online-softmax reduction.
            dimension_semantics=("parallel", "parallel", "arbitrary"),
            # Explicit scoped-VMEM budget: above v5e's 16 MiB default, safely
            # under v7x's 64 MiB physical.  TODO(synk): re-derive tq/tk against
            # ~32-48 MiB double-buffered when S grows (v7x halves VMEM).
            vmem_limit_bytes=32 * 1024 * 1024,
        ),
        cost_estimate=pl.CostEstimate(
            flops=flops, transcendentals=B * S * S, bytes_accessed=bytes_accessed),
    )(x, x, w_qkv, b_qkv)


def _reference(x, wq, bq, wk, bk, wv, bv):
    """Pure-JAX f32 reference matching the PyTorch module (eval mode)."""
    S = x.shape[1]
    d = wq.shape[1]
    q = x @ wq + bq
    k = x @ wk + bk
    v = x @ wv + bv
    s = jnp.einsum("bqd,bkd->bqk", q, k)
    mask = jnp.tril(jnp.ones((S, S), dtype=jnp.float32))
    s = jnp.where(mask[None] == 0, -1e10, s)
    a = jax.nn.softmax(s / math.sqrt(d), axis=-1)
    return jnp.einsum("bqk,bkd->bqd", a, v)


if __name__ == "__main__":
    # Small config consistent with the module: hidden_dim=32, head_num=4
    # -> head_dim=8; batch=2, seq=8.
    B, S, H, D = 2, 8, 32, 8

    key = jax.random.PRNGKey(0)
    kx, kq, kbq, kk, kbk, kv, kbv = jax.random.split(key, 7)

    x = jax.random.normal(kx, (B, S, H), dtype=jnp.float32)

    # Deterministic "Linear" parameters (PyTorch stores W as (out, in); we
    # store the transpose (in, out) so the kernel computes x @ W + b).
    lim = 1.0 / math.sqrt(H)
    wq = jax.random.uniform(kq, (H, D), jnp.float32, -lim, lim)
    bq = jax.random.uniform(kbq, (1, D), jnp.float32, -lim, lim)
    wk = jax.random.uniform(kk, (H, D), jnp.float32, -lim, lim)
    bk = jax.random.uniform(kbk, (1, D), jnp.float32, -lim, lim)
    wv = jax.random.uniform(kv, (H, D), jnp.float32, -lim, lim)
    bv = jax.random.uniform(kbv, (1, D), jnp.float32, -lim, lim)

    # One-time parameter fusion (init-time, not on the forward path).
    w_qkv, b_qkv = fuse_qkv_params(wq, bq, wk, bk, wv, bv)

    attn_fn = jax.jit(functools.partial(single_dot_attention, head_dim=D))
    out = attn_fn(x, w_qkv, b_qkv)
    out = jax.block_until_ready(out)

    ref = _reference(x, wq, bq, wk, bk, wv, bv)
    assert out.shape == (B, S, D)
    # Tolerance reflects bf16 MXU operands (weights/activations/probabilities
    # rounded to bf16 per MXU-peak guidance, f32 accumulation): observed error
    # is ~1e-2 absolute at these O(1) magnitudes; softmax math itself is f32
    # with an exact divide.
    assert jnp.allclose(out, ref, atol=3e-2, rtol=3e-2), "mismatch vs JAX reference"

    print("KERNEL_OK")
</pallas_src>

<mosaic_0001>
module attributes {stable_mosaic.version = 11 : i64} {
  func.func @_flash_attn_kernel(%arg0: i32, %arg1: i32, %arg2: i32, %arg3: memref<1x8x32xf32, #tpu.memory_space<vmem>>, %arg4: memref<1x8x32xf32, #tpu.memory_space<vmem>>, %arg5: memref<32x384xbf16, #tpu.memory_space<vmem>>, %arg6: memref<1x384xf32, #tpu.memory_space<vmem>>, %arg7: memref<1x8x8xf32, #tpu.memory_space<vmem>>, %arg8: memref<8x128xbf16, #tpu.memory_space<vmem>>, %arg9: memref<8x1xf32, #tpu.memory_space<vmem>>, %arg10: memref<8x1xf32, #tpu.memory_space<vmem>>, %arg11: memref<8x128xf32, #tpu.memory_space<vmem>>) attributes {dimension_semantics = [#tpu.dimension_semantics<parallel>, #tpu.dimension_semantics<parallel>, #tpu.dimension_semantics<arbitrary>], iteration_bounds = array<i64: 2, 1, 1>, scalar_prefetch = 0 : i64, scratch_operands = 4 : i64, tpu.core_type = #tpu.core_type<tc>, window_params = [{transform_indices = @transform_0, window_bounds = array<i64: 1, 8, 32>}, {transform_indices = @transform_1, window_bounds = array<i64: 1, 8, 32>}, {pipeline_mode = #tpu.pipeline_mode<synchronous>, transform_indices = @transform_2, window_bounds = array<i64: 32, 384>}, {pipeline_mode = #tpu.pipeline_mode<synchronous>, transform_indices = @transform_3, window_bounds = array<i64: 1, 384>}, {transform_indices = @transform_4, window_bounds = array<i64: 1, 8, 8>}]} {
    %c0_i32 = arith.constant 0 : i32
    %0 = arith.cmpi eq, %arg2, %c0_i32 : i32
    %1 = arith.extui %0 : i1 to i32
    %c0_i32_0 = arith.constant 0 : i32
    %2 = arith.cmpi ne, %1, %c0_i32_0 : i32
    scf.if %2 {
      %cst = arith.constant 0xFF800000 : f32
      %12 = vector.broadcast %cst : f32 to vector<8x1xf32>
      %c0 = arith.constant 0 : index
      %c0_5 = arith.constant 0 : index
      %13 = vector.load %arg9[%c0, %c0_5] : memref<8x1xf32, #tpu.memory_space<vmem>>, vector<8x1xf32>
      tpu.vector_store %arg9[%c0, %c0_5], %12 {strides = array<i32>} : memref<8x1xf32, #tpu.memory_space<vmem>>, vector<8x1xf32>,
      %cst_6 = arith.constant 0.000000e+00 : f32
      %14 = vector.broadcast %cst_6 : f32 to vector<8x1xf32>
      %c0_7 = arith.constant 0 : index
      %c0_8 = arith.constant 0 : index
      %15 = vector.load %arg10[%c0_7, %c0_8] : memref<8x1xf32, #tpu.memory_space<vmem>>, vector<8x1xf32>
      tpu.vector_store %arg10[%c0_7, %c0_8], %14 {strides = array<i32>} : memref<8x1xf32, #tpu.memory_space<vmem>>, vector<8x1xf32>,
      %cst_9 = arith.constant 0.000000e+00 : f32
      %16 = vector.broadcast %cst_9 : f32 to vector<8x128xf32>
      %c0_10 = arith.constant 0 : index
      %c0_11 = arith.constant 0 : index
      %17 = vector.load %arg11[%c0_10, %c0_11] : memref<8x128xf32, #tpu.memory_space<vmem>>, vector<8x128xf32>
      tpu.vector_store %arg11[%c0_10, %c0_11], %16 {strides = array<i32>} : memref<8x128xf32, #tpu.memory_space<vmem>>, vector<8x128xf32>,
      %c0_12 = arith.constant 0 : index
      %c0_13 = arith.constant 0 : index
      %c0_14 = arith.constant 0 : index
      %18 = vector.load %arg3[%c0_12, %c0_13, %c0_14] : memref<1x8x32xf32, #tpu.memory_space<vmem>>, vector<1x8x32xf32>
      %19 = vector.shape_cast %18 : vector<1x8x32xf32> to vector<8x32xf32>
      %20 = arith.truncf %19 : vector<8x32xf32> to vector<8x32xbf16>
      %c0_15 = arith.constant 0 : index
      %c0_16 = arith.constant 0 : index
      %21 = vector.load %arg5[%c0_15, %c0_16] : memref<32x384xbf16, #tpu.memory_space<vmem>>, vector<32x128xbf16>
      %cst_17 = arith.constant dense<0.000000e+00> : vector<8x128xf32>
      %22 = tpu.matmul %20, %21, %cst_17 {dimension_numbers = #tpu.dot_dimension_numbers<[1], [0], [0], [1], [0, 0, 1, 1], [], []>} : vector<8x32xbf16>, vector<32x128xbf16>, vector<8x128xf32> -> vector<8x128xf32>
      %c0_18 = arith.constant 0 : index
      %c0_19 = arith.constant 0 : index
      %23 = vector.load %arg6[%c0_18, %c0_19] : memref<1x384xf32, #tpu.memory_space<vmem>>, vector<1x128xf32>
      %24 = vector.broadcast %23 : vector<1x128xf32> to vector<8x128xf32>
      %25 = arith.addf %22, %24 : vector<8x128xf32>
      %cst_20 = arith.constant 0.353553385 : f32
      %26 = vector.broadcast %cst_20 : f32 to vector<8x128xf32>
      %27 = arith.mulf %25, %26 : vector<8x128xf32>
      %28 = arith.truncf %27 : vector<8x128xf32> to vector<8x128xbf16>
      %c0_21 = arith.constant 0 : index
      %c0_22 = arith.constant 0 : index
      %29 = vector.load %arg8[%c0_21, %c0_22] : memref<8x128xbf16, #tpu.memory_space<vmem>>, vector<8x128xbf16>
      tpu.vector_store %arg8[%c0_21, %c0_22], %28 {strides = array<i32>} : memref<8x128xbf16, #tpu.memory_space<vmem>>, vector<8x128xbf16>,
    } else {
    }
    %c8_i32 = arith.constant 8 : i32
    %3 = arith.muli %arg2, %c8_i32 : i32
    %c1_i32 = arith.constant 1 : i32
    %4 = arith.addi %arg1, %c1_i32 : i32
    %c8_i32_1 = arith.constant 8 : i32
    %5 = arith.muli %4, %c8_i32_1 : i32
    %6 = arith.cmpi slt, %3, %5 : i32
    %7 = arith.extui %6 : i1 to i32
    %c0_i32_2 = arith.constant 0 : i32
    %8 = arith.cmpi ne, %7, %c0_i32_2 : i32
    scf.if %8 {
      %c0 = arith.constant 0 : index
      %c0_5 = arith.constant 0 : index
      %c0_6 = arith.constant 0 : index
      %12 = vector.load %arg4[%c0, %c0_5, %c0_6] : memref<1x8x32xf32, #tpu.memory_space<vmem>>, vector<1x8x32xf32>
      %13 = vector.shape_cast %12 : vector<1x8x32xf32> to vector<8x32xf32>
      %14 = arith.truncf %13 : vector<8x32xf32> to vector<8x32xbf16>
      %c0_7 = arith.constant 0 : index
      %c128 = arith.constant 128 : index
      %15 = vector.load %arg5[%c0_7, %c128] : memref<32x384xbf16, #tpu.memory_space<vmem>>, vector<32x256xbf16>
      %cst = arith.constant dense<0.000000e+00> : vector<8x256xf32>
      %16 = tpu.matmul %14, %15, %cst {dimension_numbers = #tpu.dot_dimension_numbers<[1], [0], [0], [1], [0, 0, 1, 1], [], []>} : vector<8x32xbf16>, vector<32x256xbf16>, vector<8x256xf32> -> vector<8x256xf32>
      %c0_8 = arith.constant 0 : index
      %c128_9 = arith.constant 128 : index
      %17 = vector.load %arg6[%c0_8, %c128_9] : memref<1x384xf32, #tpu.memory_space<vmem>>, vector<1x256xf32>
      %18 = vector.broadcast %17 : vector<1x256xf32> to vector<8x256xf32>
      %19 = arith.addf %16, %18 : vector<8x256xf32>
      %20 = vector.extract_strided_slice %19 {offsets = [0, 0], sizes = [8, 128], strides = [1, 1]} : vector<8x256xf32> to vector<8x128xf32>
      %21 = arith.truncf %20 : vector<8x128xf32> to vector<8x128xbf16>
      %22 = vector.extract_strided_slice %19 {offsets = [0, 128], sizes = [8, 128], strides = [1, 1]} : vector<8x256xf32> to vector<8x128xf32>
      %23 = arith.truncf %22 : vector<8x128xf32> to vector<8x128xbf16>
      %c0_10 = arith.constant 0 : index
      %c0_11 = arith.constant 0 : index
      %24 = vector.load %arg8[%c0_10, %c0_11] : memref<8x128xbf16, #tpu.memory_space<vmem>>, vector<8x128xbf16>
      %cst_12 = arith.constant dense<0.000000e+00> : vector<8x8xf32>
      %25 = tpu.matmul %24, %21, %cst_12 {dimension_numbers = #tpu.dot_dimension_numbers<[1], [1], [0], [0], [0, 0, 1, 0], [], []>} : vector<8x128xbf16>, vector<8x128xbf16>, vector<8x8xf32> -> vector<8x8xf32>
      %c8_i32_13 = arith.constant 8 : i32
      %26 = arith.muli %arg1, %c8_i32_13 : i32
      %27 = tpu.iota {dimensions = array<i32: 0>} : vector<8x8xi32>
      %28 = vector.broadcast %26 : i32 to vector<8x8xi32>
      %29 = arith.addi %28, %27 : vector<8x8xi32>
      %c8_i32_14 = arith.constant 8 : i32
      %30 = arith.muli %arg2, %c8_i32_14 : i32
      %31 = tpu.iota {dimensions = array<i32: 1>} : vector<8x8xi32>
      %32 = vector.broadcast %30 : i32 to vector<8x8xi32>
      %33 = arith.addi %32, %31 : vector<8x8xi32>
      %34 = arith.cmpi sge, %29, %33 : vector<8x8xi32>
      %cst_15 = arith.constant -1.000000e+30 : f32
      %35 = vector.broadcast %cst_15 : f32 to vector<8x8xf32>
      %36 = arith.select %34, %25, %35 : vector<8x8xi1>, vector<8x8xf32>
      %c0_16 = arith.constant 0 : index
      %c0_17 = arith.constant 0 : index
      %37 = vector.load %arg9[%c0_16, %c0_17] : memref<8x1xf32, #tpu.memory_space<vmem>>, vector<8x1xf32>
      %cst_18 = arith.constant dense<0xFF800000> : vector<8xf32>
      %38 = vector.multi_reduction <maximumf>, %36, %cst_18 [1] : vector<8x8xf32> to vector<8xf32>
      %39 = vector.shape_cast %38 : vector<8xf32> to vector<8x1xf32>
      %40 = arith.maximumf %37, %39 : vector<8x1xf32>
      %41 = arith.subf %37, %40 : vector<8x1xf32>
      %42 = math.exp %41 : vector<8x1xf32>
      %43 = vector.broadcast %40 : vector<8x1xf32> to vector<8x8xf32>
      %44 = arith.subf %36, %43 : vector<8x8xf32>
      %45 = math.exp %44 : vector<8x8xf32>
      %c0_19 = arith.constant 0 : index
      %c0_20 = arith.constant 0 : index
      %46 = vector.load %arg10[%c0_19, %c0_20] : memref<8x1xf32, #tpu.memory_space<vmem>>, vector<8x1xf32>
      %47 = arith.mulf %42, %46 : vector<8x1xf32>
      %cst_21 = arith.constant dense<0.000000e+00> : vector<8xf32>
      %48 = vector.multi_reduction <add>, %45, %cst_21 [1] : vector<8x8xf32> to vector<8xf32>
      %49 = vector.shape_cast %48 : vector<8xf32> to vector<8x1xf32>
      %50 = arith.addf %47, %49 : vector<8x1xf32>
      %c0_22 = arith.constant 0 : index
      %c0_23 = arith.constant 0 : index
      %51 = vector.load %arg10[%c0_22, %c0_23] : memref<8x1xf32, #tpu.memory_space<vmem>>, vector<8x1xf32>
      tpu.vector_store %arg10[%c0_22, %c0_23], %50 {strides = array<i32>} : memref<8x1xf32, #tpu.memory_space<vmem>>, vector<8x1xf32>,
      %c0_24 = arith.constant 0 : index
      %c0_25 = arith.constant 0 : index
      %52 = vector.load %arg11[%c0_24, %c0_25] : memref<8x128xf32, #tpu.memory_space<vmem>>, vector<8x128xf32>
      %53 = vector.broadcast %42 : vector<8x1xf32> to vector<8x128xf32>
      %54 = arith.mulf %53, %52 : vector<8x128xf32>
      %55 = arith.truncf %45 : vector<8x8xf32> to vector<8x8xbf16>
      %cst_26 = arith.constant dense<0.000000e+00> : vector<8x128xf32>
      %56 = tpu.matmul %55, %23, %cst_26 {dimension_numbers = #tpu.dot_dimension_numbers<[1], [0], [0], [1], [0, 0, 1, 1], [], []>} : vector<8x8xbf16>, vector<8x128xbf16>, vector<8x128xf32> -> vector<8x128xf32>
      %57 = arith.addf %54, %56 : vector<8x128xf32>
      %c0_27 = arith.constant 0 : index
      %c0_28 = arith.constant 0 : index
      %58 = vector.load %arg11[%c0_27, %c0_28] : memref<8x128xf32, #tpu.memory_space<vmem>>, vector<8x128xf32>
      tpu.vector_store %arg11[%c0_27, %c0_28], %57 {strides = array<i32>} : memref<8x128xf32, #tpu.memory_space<vmem>>, vector<8x128xf32>,
      %c0_29 = arith.constant 0 : index
      %c0_30 = arith.constant 0 : index
      %59 = vector.load %arg9[%c0_29, %c0_30] : memref<8x1xf32, #tpu.memory_space<vmem>>, vector<8x1xf32>
      tpu.vector_store %arg9[%c0_29, %c0_30], %40 {strides = array<i32>} : memref<8x1xf32, #tpu.memory_space<vmem>>, vector<8x1xf32>,
    } else {
    }
    %c0_i32_3 = arith.constant 0 : i32
    %9 = arith.cmpi eq, %arg2, %c0_i32_3 : i32
    %10 = arith.extui %9 : i1 to i32
    %c0_i32_4 = arith.constant 0 : i32
    %11 = arith.cmpi ne, %10, %c0_i32_4 : i32
    scf.if %11 {
      %c0 = arith.constant 0 : index
      %c0_5 = arith.constant 0 : index
      %12 = vector.load %arg11[%c0, %c0_5] : memref<8x128xf32, #tpu.memory_space<vmem>>, vector<8x128xf32>
      %13 = vector.extract_strided_slice %12 {offsets = [0, 0], sizes = [8, 8], strides = [1, 1]} : vector<8x128xf32> to vector<8x8xf32>
      %c0_6 = arith.constant 0 : index
      %c0_7 = arith.constant 0 : index
      %14 = vector.load %arg10[%c0_6, %c0_7] : memref<8x1xf32, #tpu.memory_space<vmem>>, vector<8x1xf32>
      %15 = vector.broadcast %14 : vector<8x1xf32> to vector<8x8xf32>
      %16 = arith.divf %13, %15 : vector<8x8xf32>
      %c0_8 = arith.constant 0 : index
      %c0_9 = arith.constant 0 : index
      %c0_10 = arith.constant 0 : index
      %17 = vector.load %arg7[%c0_8, %c0_9, %c0_10] : memref<1x8x8xf32, #tpu.memory_space<vmem>>, vector<1x8x8xf32>
      %18 = vector.shape_cast %17 : vector<1x8x8xf32> to vector<8x8xf32>
      %19 = vector.shape_cast %16 : vector<8x8xf32> to vector<1x8x8xf32>
      tpu.vector_store %arg7[%c0_8, %c0_9, %c0_10], %19 {strides = array<i32>} : memref<1x8x8xf32, #tpu.memory_space<vmem>>, vector<1x8x8xf32>,
    } else {
    }
    return
  }
  func.func @transform_0(%arg0: i32, %arg1: i32, %arg2: i32) -> (i32, i32, i32) {
    %c0_i32 = arith.constant 0 : i32
    %c0_i32_0 = arith.constant 0 : i32
    return %arg0, %arg1, %c0_i32 : i32, i32, i32
  }
  func.func @transform_1(%arg0: i32, %arg1: i32, %arg2: i32) -> (i32, i32, i32) {
    %c0_i32 = arith.constant 0 : i32
    %c0_i32_0 = arith.constant 0 : i32
    return %arg0, %arg2, %c0_i32 : i32, i32, i32
  }
  func.func @transform_2(%arg0: i32, %arg1: i32, %arg2: i32) -> (i32, i32) {
    %c0_i32 = arith.constant 0 : i32
    %c0_i32_0 = arith.constant 0 : i32
    %c0_i32_1 = arith.constant 0 : i32
    return %c0_i32, %c0_i32_0 : i32, i32
  }
  func.func @transform_3(%arg0: i32, %arg1: i32, %arg2: i32) -> (i32, i32) {
    %c0_i32 = arith.constant 0 : i32
    %c0_i32_0 = arith.constant 0 : i32
    %c0_i32_1 = arith.constant 0 : i32
    return %c0_i32, %c0_i32_0 : i32, i32
  }
  func.func @transform_4(%arg0: i32, %arg1: i32, %arg2: i32) -> (i32, i32, i32) {
    %c0_i32 = arith.constant 0 : i32
    %c0_i32_0 = arith.constant 0 : i32
    return %arg0, %arg1, %c0_i32 : i32, i32, i32
  }
}

</mosaic_0001>

<bundles_post_ra>
// kernel: single_dot_attention.1
= control target key start
LH: loop header
LB: loop body
LE: loop exit
PB: predicated region body
PF: predicated region fallthrough
CT: control target
= control target key end

     0   :  { %s1390_s0 = inlined_call_operand.hbm [shape: f32[2,8,32], index: 0, kind: input, shape index: {}, may-alias: {0,1}]   ;;  %s1391_s1 = inlined_call_operand.hbm [shape: f32[2,8,32], index: 1, kind: input, shape index: {}, may-alias: {0,1}]   ;;  %s1392_s2 = inlined_call_operand.hbm [shape: bf16[32,384], index: 2, kind: input, shape index: {}]   ;;  %s1393_s3 = inlined_call_operand.vmem [shape: f32[1,384], index: 3, kind: input, shape index: {}]   ;;  %s1394_s4 = inlined_call_operand.hbm [shape: f32[2,8,8], index: 4, kind: output, shape index: {}]  }
   0x1   :  { %1401 = sst [smem:[#allocation19_spill]] %s1392_s2 }
   0x2   :  { %9 = vsyncpa [#allocation7], 0 }
   0x3   :  { %11 = vsyncpa [#allocation7 + $0x1], 0 }
   0x4   :  { %12 = vsyncpa [#allocation10], 0 }
   0x5   :  { %14 = vsyncpa [#allocation10 + $0x1], 0 }
   0x6   :  { %15 = vsyncpa [#allocation8], 0 }
   0x7   :  { %17 = vsyncpa [#allocation8 + $0x1], 0  ;;  %s1114_s15 = smov 0   ;;  %s1116_s16 = smov 0  }
   0x8   :  { %s1118_s17 = smov 0   ;;  %s1120_s18 = smov 0  }
   0x9   :  { %s1122_s19 = smov 0   ;;  %s1124_s20 = smov 0  }
   0xa LB: > { %1402 = sst [smem:[#allocation17_spill]] %s1073_s19  ;;  %s1145_s21 = sadd.s32 4294967295, %s1077_s20   ;;  %s1077_s20 = sphi %s1124_s20, %s23_s20   ;;  %s1073_s19 = sphi %s1122_s19, %s1421_s19   ;;  %s1069_s18 = sphi %s1120_s18, %s1420_s18   ;;  %s1065_s17 = sphi %s1118_s17, %s1424_s17   ;;  %s1061_s16 = sphi %s1116_s16, %s1423_s16   ;;  %s1057_s15 = sphi %s1114_s15, %s1422_s15  }
   0xb   : > { %s745_s22 = sadd.s32 4294967294, %s1077_s20   ;;  %p64_p0 = scmp.ne.s32.totalorder %s1061_s16, %s1057_s15 }
   0xc   : > { %p1395_p1 = scmp.eq.s32.totalorder %s1145_s21, 0  ;;  %p166_p3 = scmp.eq.s32.totalorder %s745_s22, 1 }
   0xd   : > { %p746_p5 = scmp.ge.s32.totalorder %s1077_s20, 1  ;;  %p173_p7 = scmp.lt.s32.totalorder %s1077_s20, 3 }
   0xe   : > { %p1154_p4 = por %p1395_p1, %p64_p0  ;;  %p1159_p6 = por %p166_p3, %p64_p0 }
   0xf   : > { %p1164_p8 = pnand %p746_p5, %p173_p7  ;;  %s1079_s26 = smov [#allocation11]  }
  0x10   : > { %s1403_s23 = scalar_select %p1154_p4, 1, 0 }
  0x11   : > { %s1404_s24 = scalar_select %p1159_p6, 1, 0 }
  0x12   : > { %s1405_s25 = scalar_select %p1164_p8, 1, 0 }
  0x13   : > { %s185_s27 = sshll.u32 %s1079_s26, 4  ;;  %p809_p9 = pneg %p1164_p8  ;;  %s186_s27 = int_to_ptr.vmem [resolvable:$true] %s185_s27 }
  0x14   : > { %s42_s29 = sadd.s32 1, %s1073_s19  ;;  %s1407_s2 = sld [smem:[#allocation19_spill]] }
  0x15   : > { %p1173_p11 = pnand %p809_p9, %p1395_p1 }
  0x17   : > { %p901_p13 = pneg %p1173_p11 }
  0x1a   : > { %s899_s6 = scalar_lea.hbm %s1407_s2, 768 }
  0x1b   : > { %p900_p12 = scmp.ne.s32.totalorder %s1407_s2, %s899_s6  ;;  %p906_p5 = scmp.lt.u32.totalorder %s899_s6, %s1407_s2 }
  0x1d   : > { %p902_p0 = pnand %p901_p13, %p900_p12 }
  0x1f   : > { %p903_p3 = pneg %p902_p0 }
  0x21   : > { %p908_p7 = pnand %p906_p5, %p903_p3 }
  0x23   : > { %911 = shalt.err (!%p908_p7)
}
  0x24   : > { %s912_s11 = scalar_lea.vmem %s186_s27, 768  ;;  %p920_p2 = scmp.lt.s32.totalorder %s186_s27, %s186_s27 }
  0x25   : > { %p913_p9 = scmp.ne.s32.totalorder %s186_s27, %s912_s11  ;;  %p921_p6 = scmp.lt.s32.totalorder %s912_s11, %s912_s11 }
  0x27   : > { %p915_p10 = pnand %p913_p9, %p901_p13  ;;  %p922_p4 = por %p921_p6, %p920_p2 }
  0x29   : > { %p916_p1 = pneg %p915_p10 }
  0x2b   : > { %p923_p8 = pnand %p922_p4, %p916_p1 }
  0x2d   : > { %926 = shalt.err (!%p923_p8)
}
  0x2e   : > { %s1080_s12 = smov 192   ;;  %s1081_s13 = smov 12  }
  0x2f   : > { %812 = dma.hbm_to_vmem [thread:$0]  (!%p1173_p11), %s1407_s2, 768, %s186_s27, [#allocation10], %s1080_s12, %s1080_s12, %s1081_s13  }
  0x30   : > { %p44_p1 = scmp.ge.s32.totalorder %s42_s29, 2  ;;  %s51_s26 = sadd.s32 1, %s1065_s17 }
  0x31   : > { %p58_p2 = scmp.ne.s32.totalorder %s1065_s17, %s1061_s16  ;;  %p59_p4 = scmp.eq.s32.totalorder %s1077_s20, 0 }
  0x32   : > { %s1426_s29 = smov (%p44_p1, %s42_s29), 0  ;;  %p1410_p8 = scmp.eq.s32.totalorder %s1145_s21, 1 }
  0x33   : > { %1408 = sst [smem:[#allocation18_spill]] %s1426_s29  ;;  %p1200_p6 = por %p59_p4, %p58_p2 }
  0x34   : > { %p1206_p10 = por %p1410_p8, %p58_p2  ;;  %s46_s5 = ssub.s32 %s1073_s19, %s1426_s29 }
  0x35   : > { %p825_p11 = scmp.lt.s32.totalorder %s1077_s20, 2  ;;  %p49_p12 = scmp.eq.s32.totalorder %s46_s5, 0 }
  0x36   : > { %s1411_s28 = scalar_select %p1206_p10, 1, 0 }
  0x37   : > { %s202_s27 = sand.u32 1, %s1065_s17   ;;  %s750_s8 = sshll.u32 %s1073_s19, 7 }
  0x38   : > { %s1214_s6 = sshll.u32 %s202_s27, 3  ;;  %s1223_s11 = scalar_lea.hbm %s1390_s0, %s750_s8 }
  0x39   : > { %s1217_s7 = scalar_select %p49_p12, %s1065_s17, %s51_s26  }
  0x3a   : > { %s206_s12 = scalar_lea.vmem [#allocation6], %s1214_s6  ;;  %p1230_p13 = pnand %p825_p11, %p1200_p6 }
  0x3b   : > { %s214_s13 = sshll.u32 %s206_s12, 4  ;;  %s1237_s5 = scalar_lea.hbm %s1391_s1, %s750_s8  ;;  %s1226_s13 = int_to_ptr.vmem [resolvable:$true] %s214_s13 }
  0x3c   : > { %s221_s9 = sand.u32 1, %s1077_s20   ;;  %s203_s10 = scalar_lea.sflag [#allocation7], %s202_s27 }
  0x3d   : > { %s927_s2 = scalar_lea.hbm %s1223_s11, 128  ;;  %p929_p3 = pneg %p1230_p13 }
  0x3e   : > { %p928_p0 = scmp.ne.s32.totalorder %s1223_s11, %s927_s2  ;;  %s932_s29 = scalar_lea.hbm %s1390_s0, 256 }
  0x3f   : > { %p933_p9 = scmp.lt.u32.totalorder %s1223_s11, %s1390_s0  ;;  %p934_p1 = scmp.lt.u32.totalorder %s932_s29, %s927_s2 }
  0x40   : > { %p930_p5 = pnand %p929_p3, %p928_p0  ;;  %p936_p4 = scmp.lt.u32.totalorder %s927_s2, %s1223_s11 }
  0x41   : > { %p935_p2 = por %p934_p1, %p933_p9 }
  0x42   : > { %p931_p7 = pneg %p930_p5 }
  0x43   : > { %p937_p6 = por %p936_p4, %p935_p2 }
  0x45   : > { %p938_p8 = pnand %p937_p6, %p931_p7 }
  0x47   : > { %941 = shalt.err (!%p938_p8)
}
  0x48   : > { %s942_s27 = scalar_lea.vmem %s1226_s13, 128  ;;  %s1082_s8 = smov [#allocation6]  }
  0x49   : > { %p943_p11 = scmp.ne.s32.totalorder %s1226_s13, %s942_s27  ;;  %s947_s26 = sshll.u32 %s1082_s8, 4  ;;  %s948_s26 = int_to_ptr.vmem [resolvable:$false] %s947_s26 }
  0x4a   : > { %s949_s19 = scalar_lea.vmem %s948_s26, 256  ;;  %p950_p5 = scmp.lt.s32.totalorder %s1226_s13, %s948_s26 }
  0x4b   : > { %p945_p12 = pnand %p943_p11, %p929_p3  ;;  %p951_p9 = scmp.lt.s32.totalorder %s949_s19, %s942_s27 }
  0x4d   : > { %p946_p0 = pneg %p945_p12  ;;  %p952_p1 = por %p951_p9, %p950_p5 }
  0x4f   : > { %p953_p2 = pnand %p952_p1, %p946_p0 }
  0x51   : > { %956 = shalt.err (!%p953_p2)
}
  0x52   : > { %816 = dma.hbm_to_vmem [thread:$0]  (!%p1230_p13), %s1223_s11, 128, %s1226_s13, %s203_s10  }
  0x53   : > { %s225_s2 = scalar_lea.vmem [#allocation9], %s1214_s6  ;;  %s222_s30 = scalar_lea.sflag [#allocation10], %s221_s9 }
  0x54   : > { %s233_s29 = sshll.u32 %s225_s2, 4  ;;  %s957_s12 = scalar_lea.hbm %s1237_s5, 128  ;;  %s234_s29 = int_to_ptr.vmem [resolvable:$true] %s233_s29 }
  0x55   : > { %p958_p7 = scmp.ne.s32.totalorder %s1237_s5, %s957_s12  ;;  %s962_s8 = scalar_lea.hbm %s1391_s1, 256 }
  0x56   : > { %p963_p8 = scmp.lt.u32.totalorder %s1237_s5, %s1391_s1  ;;  %p964_p11 = scmp.lt.u32.totalorder %s962_s8, %s957_s12 }
  0x57   : > { %p960_p4 = pnand %p958_p7, %p929_p3  ;;  %p966_p0 = scmp.lt.u32.totalorder %s957_s12, %s1237_s5 }
  0x58   : > { %p965_p12 = por %p964_p11, %p963_p8 }
  0x59   : > { %p961_p6 = pneg %p960_p4 }
  0x5a   : > { %p967_p5 = por %p966_p0, %p965_p12 }
  0x5c   : > { %p968_p9 = pnand %p967_p5, %p961_p6 }
  0x5e   : > { %971 = shalt.err (!%p968_p9)
}
  0x5f   : > { %s972_s6 = scalar_lea.vmem %s234_s29, 128  ;;  %s1083_s11 = smov [#allocation9]  }
  0x60   : > { %p973_p1 = scmp.ne.s32.totalorder %s234_s29, %s972_s6  ;;  %s977_s13 = sshll.u32 %s1083_s11, 4  ;;  %s978_s13 = int_to_ptr.vmem [resolvable:$false] %s977_s13 }
  0x61   : > { %s979_s9 = scalar_lea.vmem %s978_s13, 256  ;;  %p980_p4 = scmp.lt.s32.totalorder %s234_s29, %s978_s13 }
  0x62   : > { %p975_p2 = pnand %p973_p1, %p929_p3  ;;  %p981_p10 = scmp.lt.s32.totalorder %s979_s9, %s972_s6 }
  0x64   : > { %p976_p7 = pneg %p975_p2  ;;  %p982_p8 = por %p981_p10, %p980_p4 }
  0x66   : > { %p983_p11 = pnand %p982_p8, %p976_p7 }
  0x68   : > { %986 = shalt.err (!%p983_p11)
}
  0x69   : > { %819 = dma.hbm_to_vmem [thread:$0]  (!%p1230_p13), %s1237_s5, 128, %s234_s29, %s222_s30  }
  0x6a   : > { %p1413_p6 = scmp.ne.s32.totalorder %s1405_s25, 0 }
  0x6b   : > { %s1290_s10 = sand.u32 (!%p1413_p6), 1, %s1061_s16   ;;  %p1414_p10 = scmp.ne.s32.totalorder (!%p1413_p6), %s1403_s23, 0 }
  0x6c   : > { %242 = sbr.rel (%p1413_p6) target bundleno = 1167 (0x48f), region = 36  ;;  %s1293_s2 = sshll.u32 (!%p1413_p6), %s1290_s10, 3 }
  0x6d   : > { %s245_s12 = scalar_lea.sflag (!%p1413_p6), [#allocation7], %s1290_s10  ;;  %s248_s22 = scalar_lea.vmem (!%p1413_p6), [#allocation6], %s1293_s2 }
  0x73   : > { %1040 = dma.done.wait (%p1414_p10), %s245_s12, 128  }
  0x74   : > { %1042 = vsyncadd (%p1414_p10), %s245_s12, 4294967168  ;;  %s253_s25 = sand.u32 1, %s1145_s21   ;;  %s257_s5 = scalar_lea.vmem [#allocation9], %s1293_s2 }
  0x75   : > { %s254_s14 = scalar_lea.sflag [#allocation10], %s253_s25 }
  0x76   : > { %1044 = dma.done.wait (%p1414_p10), %s254_s14, 128  }
  0x77   : > { %1046 = vsyncadd (%p1414_p10), %s254_s14, 4294967168  ;;  %p1415_p13 = scmp.eq.s32.totalorder %s1145_s21, 0 }
  0x79   : > { %1048 = dma.done.wait (%p1415_p13), [#allocation10], 768   ;;  %p1416_p3 = pmov %p1415_p13 }
  0x7a   : > { %v1084_v0 = vmov 0.0   ;;  %vm1085_vm0 = vmmov 0   ;;  %v1086_v1 = vmov 0   ;;  %v885_v2 = vld [vmem:[#allocation11] ss:$12 sps:$4 sm:$0xff]   ;;  %v379_v10 = vld [vmem:[%s257_s5] sm:$0xff]  ;;  %v387_v12 = vlaneseq }
  0x7b   : > { %1050 = vsyncadd (%p1416_p3), [#allocation10], 4294966528  ;;  %779 = vmatprep.subr.bf16.mxu0 %v1084_v0  ;;  %783 = vmatprep.mubr.msk.bf16.mxu0 %vm1085_vm0, %v1084_v0  ;;  %v886_v3 = vld [vmem:[#allocation11 + $0x8] ss:$12 sps:$4 sm:$0xff]   ;;  %v888_v4 = vld [vmem:[#allocation11 + $0x4] ss:$12 sps:$4 sm:$0xff]   ;;  %v380_v11 = vpack.c.bf16 %v379_v10, %v379_v10 }
  0x7c   : > { %453 = vmatprep.mubr.bf16.mxu1 %v1086_v1  ;;  %883 = vset.pattern.permute.xlu0 %v1086_v1  ;;  %v889_v5 = vld [vmem:[#allocation11 + $0x18] ss:$12 sps:$4 sm:$0xff]   ;;  %v890_v6 = vld [vmem:[#allocation11 + $0x20] ss:$12 sps:$4 sm:$0xff]   ;;  %v892_v7 = vld [vmem:[#allocation11 + $0x1c] ss:$12 sps:$4 sm:$0xff]  }
  0x7d   : > { %884 = vset.pattern.permute.xlu1 %v1086_v1  ;;  %780 = vmatpush3.bf16.msra.mxu0 %v885_v2  ;;  %v300_v8 = vld [vmem:[%s248_s22] sm:$0xff]  ;;  %vm325_vm1 = vcmask 261120   ;;  %v388_v13 = vshrl.u32 %v387_v12, 7  ;;  %vm552_vm2 = vcmask 1043456   ;;  %vm296_vm3 = vcmask 7168   ;;  %s769_s27 = sshll.u32 %s1069_s18, 7 }
  0x7e   : > { %421 = vmatprep.subr.bf16.mxu1 %v886_v3  ;;  %781 = vmatprep.subr.bf16.mxu0 %v1084_v0  ;;  %v301_v9 = vpack.c.bf16 %v300_v8, %v300_v8  ;;  %v385_v15 = vld [vmem:[%s1393_s3 + $0x1] sm:$0x3]  ;;  %v758_v17 = vld [vmem:[%s1393_s3] ss:$0 sm:$0xff]  ;;  %v1087_v37 = vmov -inf   ;;  %298 = vst.msk [vmem:[#allocation4] sm:$0xff] %vm296_vm3, %v1084_v0  ;;  %s1340_s11 = scalar_lea.hbm %s1394_s4, %s769_s27 }
  0x7f   : > { %422 = vmatpush1.bf16.msra.mxu1 %v888_v4  ;;  %v389_v14 = vsub.s32 0, %v388_v13  ;;  %v393_v16 = vsub.s32 1, %v388_v13  ;;  %297 = vst.msk [vmem:[#allocation3] sm:$0xff] %vm296_vm3, %v1087_v37  ;;  %v511_v38 = vand.u32 127, %v387_v12  ;;  %vm517_vm5 = vcmask 64512   ;;  %s290_s8 = scalar_lea.vmem [#allocation12], %s1293_s2 }
  0x80   : > { %423 = vmatprep.subr.bf16.mxu1 %v890_v6  ;;  %s628_s26 = sshll.u32 %s290_s8, 4  ;;  %s614_s13 = scalar_lea.sflag [#allocation8], %s1290_s10  ;;  %s1342_s26 = int_to_ptr.vmem [resolvable:$true] %s628_s26 }
  0x81   : > { %782 = vmatpush3.bf16.msra.mxu0 %v889_v5  ;;  %v390_v18 = vrot.slane %v385_v15, %v389_v14  ;;  %v394_v20 = vrot.slane %v385_v15, %v393_v16  ;;  %vm514_vm4 = vcmp.ge.s32.totalorder %v388_v13, %v511_v38  ;;  %s987_s9 = scalar_lea.vmem %s1342_s26, 128  ;;  %p1417_p0 = scmp.ne.s32.totalorder %s1411_s28, 0 }
  0x82   : > { %787 = vmatprep.subr.bf16.mxu0 %v1084_v0  ;;  %p988_p12 = scmp.ne.s32.totalorder %s1342_s26, %s987_s9  ;;  %s1088_s18 = smov [#allocation12]  }
  0x83   : > { %424 = vmatpush1.bf16.msra.mxu1 %v892_v7  ;;  %s991_s2 = sshll.u32 %s1088_s18, 4  ;;  %s992_s2 = int_to_ptr.vmem [resolvable:$false] %s991_s2 }
  0x84   : > { %784 = vmatmul.mubr.msk.bf16.vlgmr.msra.gmra.mrb[0].mxu0 %vm325_vm1, %v301_v9  ;;  %793 = vmatprep.subr.bf16.mxu1 %v1084_v0  ;;  %p989_p5 = pnand %p988_p12, %p1417_p0  ;;  %s993_s12 = scalar_lea.vmem %s992_s2, 256 }
  0x85   : > { %789 = vmatprep.mubr.msk.bf16.mxu0 %vm1085_vm0, %v1084_v0  ;;  %v533_v57 = vld [vmem:[#allocation4] sm:$0xff]  ;;  %p994_p1 = scmp.lt.s32.totalorder %s1342_s26, %s992_s2  ;;  %p995_p2 = scmp.lt.s32.totalorder %s993_s12, %s987_s9 }
  0x86   : > { %766 = vmatmul.mubr.msk.bf16.vlgmr.msra.gmra.mrb[0].mxu1 %vm325_vm1, %v380_v11  ;;  %v516_v45 = vld [vmem:[#allocation3] sm:$0xff]  ;;  %p990_p9 = pneg %p989_p5 }
  0x87   : > { %795 = vmatprep.mubr.msk.bf16.mxu1 %vm1085_vm0, %v1084_v0  ;;  %p996_p7 = por %p995_p2, %p994_p1 }
  0x89   : > { %p997_p4 = pnand %p996_p7, %p990_p9 }
 0x157   : > { %v363_v19 = vpop.f32.mrb[0].mxu0 }
 0x158   : > { %v364_v21 = vadd.f32 %v758_v17, %v363_v19  ;;  %v785_v22 = vpop.f32.mrb[1].mxu0 }
 0x159   : > { %v455_v23 = vpop.f32.mrb[0].mxu1  ;;  %v366_v24 = vpop.f32.mrb[2].mxu0 }
 0x15a   : > { %v369_v25 = vmul.f32 0.35355338, %v364_v21  ;;  %v456_v26 = vadd.f32 %v455_v23, %v390_v18  ;;  %v457_v27 = vpop.f32.mrb[1].mxu1  ;;  %v786_v28 = vpop.f32.mrb[3].mxu0 }
 0x15b   : > { %v458_v29 = vadd.f32 %v457_v27, %v394_v20  ;;  %v459_v30 = vpop.f32.mrb[2].mxu1 }
 0x15c   : > { %v370_v31 = vpack.c.bf16 %v369_v25, %v369_v25  ;;  %v462_v32 = vpack.c.bf16 %v456_v26, %v456_v26  ;;  %v460_v33 = vpop.f32.mrb[3].mxu1 }
 0x15d   : > { %v463_v34 = vpack.c.bf16 %v458_v29, %v458_v29 }
 0x15e   : > { %371 = vst [vmem:[#allocation2] sm:$0xf] %v370_v31  ;;  %788 = vmatpush3.bf16.xpose.msra.mxu0 %v462_v32 }
 0x15f   : > { %v554_v35 = vsel %vm552_vm2, %v463_v34, 0 }
 0x160   : > { %794 = vmatpush3.bf16.msra.mxu1 %v554_v35 }
 0x165   : > { %v464_v36 = vld [vmem:[#allocation2] sm:$0xf] }
 0x166   : > { %790 = vmatmul.mubr.bf16.vlgmr.msra.gmra.mrb[4].mxu0 %v464_v36 }
 0x239   : > { %v499_v39 = vpop.f32.mrb[4].mxu0 }
 0x23a   : > { %v515_v40 = vsel %vm514_vm4, %v499_v39, -1e+30  ;;  %v791_v41 = vpop.f32.mrb[5].mxu0 }
 0x23b   : > { %v502_v42 = vpop.f32.mrb[6].mxu0  ;;  %v518_v43 = vsel %vm517_vm5, %v515_v40, -inf }
 0x23c   : > { %519 = vmax.xlane.f32.xlu0 %v518_v43  ;;  %v792_v44 = vpop.f32.mrb[7].mxu0 }
 0x2c9   : > { %v520_v46 = vpop.xlane.xlu0 %519 }
 0x2ca   : > { %v521_v47 = vmax.f32 %v516_v45, %v520_v46 }
 0x2cc   : > { %v522_v48 = vsub.f32 %v516_v45, %v521_v47  ;;  %598 = vst.msk [vmem:[#allocation3] sm:$0xff] %vm296_vm3, %v521_v47  ;;  %527 = vperm.xlu0 %883, %v521_v47  }
 0x2ce   : > { %v523_v55 = vmul.f32 1.442695, %v522_v48 }
 0x34b   : > { %v528_v49 = vpop.permute.xlu0 %527 }
 0x34c   : > { %v530_v50 = vsub.f32 %v515_v40, %v528_v49 }
 0x34e   : > { %v531_v51 = vmul.f32 1.442695, %v530_v50 }
 0x350   : > { %893 = vpow2.f32 %v531_v51 }
 0x351   : > { %895 = vpow2.f32 %v523_v55 }
 0x35a   : > { %v894_v52 = vpop.eup %893 }
 0x35b   : > { %v535_v53 = vsel %vm517_vm5, %v894_v52, 0.0  ;;  %v548_v54 = vpack.c.bf16 %v894_v52, %v894_v52  ;;  %v896_v56 = vpop.eup %895 }
 0x35c   : > { %536 = vadd.xlane.f32.xlu1 %v535_v53  ;;  %v534_v58 = vmul.f32 %v896_v56, %v533_v57 }
 0x35d   : > { %796 = vmatmul.mubr.msk.bf16.vlgmr.msra.gmra.mrb[4].mxu1 %vm517_vm5, %v548_v54 }
 0x3e9   : > { %v537_v59 = vpop.xlane.xlu1 %536 }
 0x3ea   : > { %v538_v60 = vadd.f32 %v537_v59, %v534_v58 }
 0x3ec   : > { %540 = vst.msk [vmem:[#allocation4] sm:$0xff] %vm296_vm3, %v538_v60 }
 0x3f3   : > { %v603_v61 = vld [vmem:[#allocation4] sm:$0xff] }
 0x3f4   : > { %606 = vperm.xlu1 %884, %v603_v61  }
 0x3f8   : > { %544 = vperm.xlu1 %884, %v896_v56  }
 0x430   : > { %v590_v62 = vpop.f32.mrb[4].mxu1 }
 0x431   : > { %v797_v63 = vpop.f32.mrb[5].mxu1 }
 0x432   : > { %v593_v0 = vpop.f32.mrb[6].mxu1 }
 0x433   : > { %v798_v1 = vpop.f32.mrb[7].mxu1 }
 0x473   : > { %v607_v2 = vpop.permute.xlu1 %606 }
 0x474   : > { %897 = vrcp.f32 %v607_v2 }
 0x477   : > { %v545_v3 = vpop.permute.xlu1 %544 }
 0x478   : > { %v547_v4 = vmul.f32 0.0, %v545_v3 }
 0x47a   : > { %v596_v5 = vadd.f32 %v590_v62, %v547_v4 }
 0x47e   : > { %v898_v6 = vpop.eup %897 }
 0x47f   : > { %v610_v7 = vmul.f32 %v898_v6, %v596_v5 }
 0x481   : > { %612 = vst.msk [vmem:[%s290_s8] sm:$0xff] %vm517_vm5, %v610_v7 }
 0x482   : > { %1000 = shalt.err (!%p997_p4)
}
 0x483   : > { %s1001_s10 = scalar_lea.hbm %s1340_s11, 128  ;;  %s1005_s14 = scalar_lea.hbm %s1394_s4, 256 }
 0x484   : > { %p1002_p8 = scmp.ne.s32.totalorder %s1340_s11, %s1001_s10  ;;  %p1006_p10 = scmp.lt.u32.totalorder %s1340_s11, %s1394_s4 }
 0x485   : > { %p1007_p13 = scmp.lt.u32.totalorder %s1005_s14, %s1001_s10  ;;  %p1009_p12 = scmp.lt.u32.totalorder %s1001_s10, %s1340_s11 }
 0x486   : > { %p1003_p11 = pnand %p1002_p8, %p1417_p0 }
 0x487   : > { %p1008_p3 = por %p1007_p13, %p1006_p10 }
 0x488   : > { %p1004_p6 = pneg %p1003_p11 }
 0x489   : > { %p1010_p5 = por %p1009_p12, %p1008_p3 }
 0x48b   : > { %p1011_p9 = pnand %p1010_p5, %p1004_p6 }
 0x48d   : > { %1014 = shalt.err (!%p1011_p9)
}
 0x48e   : > { %807 = dma.vmem_to_hbm [thread:$0]  (%p1417_p0), %s1342_s26, 128, %s1340_s11, %s614_s13  }
 0x48f PF: > { %s640_s23 = sand.u32 1, %s1057_s15   ;;  %p1418_p1 = scmp.ne.s32.totalorder %s1404_s24, 0 }
 0x490   : > { %p1419_p2 = scmp.ge.s32.totalorder %s1077_s20, 2  ;;  %s641_s29 = scalar_lea.sflag [#allocation8], %s640_s23 }
 0x492   : > { %p821_p7 = pnand %p1419_p2, %p1418_p1 }
 0x494   : > { %1052 = dma.done.wait (!%p821_p7), %s641_s29, 128  }
 0x495   : > { %1054 = vsyncadd (!%p821_p7), %s641_s29, 4294967168  ;;  %s23_s20 = sadd.s32 1, %s1077_s20   ;;  %s1420_s18 = sld [smem:[#allocation17_spill]] }
 0x496   : > { %p20_p4 = scmp.ge.s32.totalorder %s23_s20, 4   ;;  %s1421_s19 = sld [smem:[#allocation18_spill]] }
 0x497   : > { %s1422_s15 = smov %s1061_s16  ;;  %s1423_s16 = smov %s1065_s17 }
 0x498   : > { %s1424_s17 = smov %s1217_s7  ;;  %22 = sbr.rel (!%p20_p4) target bundleno = 10 (0xa), region = 110 }
 0x49f   :  { %646 = vsyncpa [#allocation7], 1 }
 0x4a0   :  { %648 = vsyncpa [#allocation7 + $0x1], 1 }
 0x4a1   :  { %649 = vsyncpa [#allocation10], 1 }
 0x4a2   :  { %651 = vsyncpa [#allocation10 + $0x1], 1 }
 0x4a3   :  { %652 = vsyncpa [#allocation8], 1 }
 0x4a4   :  { %654 = vsyncpa [#allocation8 + $0x1], 1 }

</bundles_post_ra>
